<compile_context>
chip_gen: v6e
topology: v6e:2x2x1
jax: 0.10.0
libtpu: 0.0.40
codegen_flags: <defaults>
</compile_context>

<pallas_src>
import functools

import jax
import jax.numpy as jnp
import numpy as np
from jax.experimental import pallas as pl
from jax.experimental.pallas import tpu as pltpu

# Logical dims of the PINN MLP:  Linear(2,20) Tanh Linear(20,20) Tanh
#                                Linear(20,20) Tanh Linear(20,1)
IN_DIM = 2
HIDDEN = 20
OUT_DIM = 1

# Padded feature-major dims.
IN_PAD = 8      # 2  -> 8   (sublane multiple)
HID_PAD = 24    # 20 -> 24  (sublane multiple; was 32)
SLAB_K = 128    # single lane-dense constant slab holding all weights/biases

# Column layout of the packed parameter slab (HID_PAD rows x SLAB_K cols).
C_W1 = 0                    # cols 0:8    w1^T  (HID_PAD, IN_PAD)
C_W2 = C_W1 + IN_PAD        # cols 8:32   w2^T  (HID_PAD, HID_PAD)
C_W3 = C_W2 + HID_PAD       # cols 32:56  w3^T  (HID_PAD, HID_PAD)
C_W4 = C_W3 + HID_PAD       # col  56     w4 column (HID_PAD, 1)
C_B1 = C_W4 + 1             # col  57
C_B2 = C_B1 + 1             # col  58
C_B3 = C_B2 + 1             # col  59
C_B4 = C_B3 + 1             # col  60     scalar bias at row 0


def pinn_kernel(x_ref, p_ref, o_ref):
    # x_ref: (IN_PAD, TM)   p_ref: (HID_PAD, SLAB_K)   o_ref: (1, TM)
    w1 = p_ref[:, C_W1:C_W1 + IN_PAD]        # (24, 8)  only cols 0,1 real
    w2 = p_ref[:, C_W2:C_W2 + HID_PAD]       # (24, 24)
    w3 = p_ref[:, C_W3:C_W3 + HID_PAD]       # (24, 24)
    w4c = p_ref[:, C_W4:C_W4 + 1]            # (24, 1)
    b1 = p_ref[:, C_B1:C_B1 + 1]             # (24, 1)
    b2 = p_ref[:, C_B2:C_B2 + 1]
    b3 = p_ref[:, C_B3:C_B3 + 1]
    b4 = p_ref[0:1, C_B4:C_B4 + 1]           # (1, 1)

    x0 = x_ref[0:1, :]                        # (1, TM)
    x1 = x_ref[1:2, :]                        # (1, TM)

    # Layer 1 on VPU: contraction length 2 -> two broadcast multiply-adds.
    h = jnp.tanh(w1[:, 0:1] * x0 + w1[:, 1:2] * x1 + b1)          # (24, TM)
    # Layers 2 and 3 on MXU.
    h = jnp.tanh(jnp.dot(w2, h, preferred_element_type=jnp.float32) + b2)
    h = jnp.tanh(jnp.dot(w3, h, preferred_element_type=jnp.float32) + b3)
    # Layer 4 on VPU + sublane (XLU) reduction: (1, TM) lane-dense result.
    y = jnp.sum(w4c * h, axis=0, keepdims=True) + b4              # (1, TM)
    o_ref[...] = y


def init_pinn_params(key):
    """PyTorch-style uniform(+-1/sqrt(fan_in)) init for the 4 Linear layers."""
    dims = [(IN_DIM, HIDDEN), (HIDDEN, HIDDEN), (HIDDEN, HIDDEN), (HIDDEN, OUT_DIM)]
    params = []
    for (fan_in, fan_out) in dims:
        key, kw, kb = jax.random.split(key, 3)
        bound = 1.0 / np.sqrt(fan_in)
        # stored as (in, out) so the reference forward is x @ W (== x @ torch_W.T)
        w = jax.random.uniform(kw, (fan_in, fan_out), jnp.float32, -bound, bound)
        b = jax.random.uniform(kb, (fan_out,), jnp.float32, -bound, bound)
        params.append((w, b))
    return params


def pack_params(params):
    """Pack all weights/biases once (at init) into one (HID_PAD, SLAB_K) slab."""
    (w1, b1), (w2, b2), (w3, b3), (w4, b4) = params
    slab = np.zeros((HID_PAD, SLAB_K), np.float32)
    slab[:HIDDEN, C_W1:C_W1 + IN_DIM] = np.asarray(w1, np.float32).T   # (20, 2)
    slab[:HIDDEN, C_W2:C_W2 + HIDDEN] = np.asarray(w2, np.float32).T   # (20, 20)
    slab[:HIDDEN, C_W3:C_W3 + HIDDEN] = np.asarray(w3, np.float32).T   # (20, 20)
    slab[:HIDDEN, C_W4] = np.asarray(w4, np.float32)[:, 0]             # (20,)
    slab[:HIDDEN, C_B1] = np.asarray(b1, np.float32)
    slab[:HIDDEN, C_B2] = np.asarray(b2, np.float32)
    slab[:HIDDEN, C_B3] = np.asarray(b3, np.float32)
    slab[0, C_B4] = float(np.asarray(b4, np.float32)[0])
    return jnp.asarray(slab)


def _choose_tm(n):
    """Pick samples-per-grid-step based on the chip generation."""
    n_pad128 = max(128, ((n + 127) // 128) * 128)
    try:
        kind = jax.devices()[0].device_kind.lower()
    except Exception:
        kind = ""
    if "v7" in kind:
        # 2 TensorCores per chip: keep the grid even so both get work,
        # cap tile so (HID_PAD x tm) activations stay comfortably in vregs.
        half = ((n_pad128 // 2 + 127) // 128) * 128
        return max(128, min(1024, half))
    # Single-TensorCore chips (v5e/v6e): the grid is a serial loop, so use
    # the fewest steps possible (~0.35 us fixed overhead per step).
    return min(2048, n_pad128)


@functools.partial(jax.jit, static_argnames=("tm",))
def _pinn_forward_impl(xy, slab, *, tm):
    n = xy.shape[0]
    n_pad = ((n + tm - 1) // tm) * tm
    grid = (n_pad // tm,)

    # Feature-major input slab (tiny: 32 B/sample).
    x_fm = jnp.zeros((IN_PAD, n_pad), jnp.float32)
    x_fm = x_fm.at[:IN_DIM, :n].set(xy.astype(jnp.float32).T)

    flops = 2 * n_pad * (IN_DIM * HIDDEN + HIDDEN * HIDDEN * 2 + HIDDEN * OUT_DIM)
    transcendentals = 3 * HIDDEN * n_pad
    bytes_accessed = n_pad * (IN_PAD * 4 + 4) + HID_PAD * SLAB_K * 4

    out_fm = pl.pallas_call(
        pinn_kernel,
        out_shape=jax.ShapeDtypeStruct((1, n_pad), jnp.float32),
        grid_spec=pltpu.PrefetchScalarGridSpec(
            num_scalar_prefetch=0,
            grid=grid,
            in_specs=[
                pl.BlockSpec((IN_PAD, tm), lambda i: (0, i)),        # x tile
                pl.BlockSpec((HID_PAD, SLAB_K), lambda i: (0, 0)),   # params (resident)
            ],
            out_specs=pl.BlockSpec((1, tm), lambda i: (0, i)),
        ),
        compiler_params=pltpu.CompilerParams(
            dimension_semantics=("parallel",)),
        cost_estimate=pl.CostEstimate(
            flops=flops,
            transcendentals=transcendentals,
            bytes_accessed=bytes_accessed),
    )(x_fm, slab)

    return out_fm[0, :n].reshape(n, 1)


def pinn_forward(xy, slab, tm=None):
    """xy: (N, 2) float32 -> (N, 1) float32 (same semantics as PINN.forward)."""
    if tm is None:
        tm = _choose_tm(xy.shape[0])
    return _pinn_forward_impl(xy, slab, tm=tm)


def pinn_forward_ref(xy, params):
    """Pure-JAX reference matching the PyTorch forward exactly."""
    h = xy.astype(jnp.float32)
    for i, (w, b) in enumerate(params):
        h = h @ w + b
        if i < len(params) - 1:
            h = jnp.tanh(h)
    return h


# TODO(synk): PINN.compute_loss needs nested autodiff (second derivatives of the
# network w.r.t. inputs); pallas_call has no default differentiation rule, so the
# training loss needs a custom_jvp/vjp or a pure-JAX fallback path.

if __name__ == "__main__":
    key = jax.random.PRNGKey(0)
    kparams, kdata = jax.random.split(key)

    params = init_pinn_params(kparams)
    slab = pack_params(params)   # padded once at init, reused across calls

    # Collocation-style points in [0,1]^2, matching the module's N=1000 batch.
    N = 1000
    xy = jax.random.uniform(kdata, (N, 2), jnp.float32)

    out = pinn_forward(xy, slab)
    out = jax.block_until_ready(out)

    ref = pinn_forward_ref(xy, params)
    assert out.shape == (N, 1), out.shape
    np.testing.assert_allclose(np.asarray(out), np.asarray(ref),
                               rtol=5e-5, atol=5e-5)

    print("KERNEL_OK")
</pallas_src>

<mosaic_0001>
module attributes {stable_mosaic.version = 11 : i64} {
  func.func @pinn_kernel(%arg0: i32, %arg1: memref<8x1024xf32, #tpu.memory_space<vmem>>, %arg2: memref<24x128xf32, #tpu.memory_space<vmem>>, %arg3: memref<1x1024xf32, #tpu.memory_space<vmem>>) attributes {dimension_semantics = [#tpu.dimension_semantics<parallel>], iteration_bounds = array<i64: 1>, scalar_prefetch = 0 : i64, scratch_operands = 0 : i64, tpu.core_type = #tpu.core_type<tc>, window_params = [{transform_indices = @transform_0, window_bounds = array<i64: 8, 1024>}, {pipeline_mode = #tpu.pipeline_mode<synchronous>, transform_indices = @transform_1, window_bounds = array<i64: 24, 128>}, {transform_indices = @transform_2, window_bounds = array<i64: 1, 1024>}]} {
    %c0 = arith.constant 0 : index
    %c0_0 = arith.constant 0 : index
    %0 = vector.load %arg2[%c0, %c0_0] : memref<24x128xf32, #tpu.memory_space<vmem>>, vector<24x8xf32>
    %c0_1 = arith.constant 0 : index
    %c8 = arith.constant 8 : index
    %1 = vector.load %arg2[%c0_1, %c8] : memref<24x128xf32, #tpu.memory_space<vmem>>, vector<24x24xf32>
    %c0_2 = arith.constant 0 : index
    %c32 = arith.constant 32 : index
    %2 = vector.load %arg2[%c0_2, %c32] : memref<24x128xf32, #tpu.memory_space<vmem>>, vector<24x24xf32>
    %c0_3 = arith.constant 0 : index
    %c56 = arith.constant 56 : index
    %3 = vector.load %arg2[%c0_3, %c56] : memref<24x128xf32, #tpu.memory_space<vmem>>, vector<24x1xf32>
    %c0_4 = arith.constant 0 : index
    %c57 = arith.constant 57 : index
    %4 = vector.load %arg2[%c0_4, %c57] : memref<24x128xf32, #tpu.memory_space<vmem>>, vector<24x1xf32>
    %c0_5 = arith.constant 0 : index
    %c58 = arith.constant 58 : index
    %5 = vector.load %arg2[%c0_5, %c58] : memref<24x128xf32, #tpu.memory_space<vmem>>, vector<24x1xf32>
    %c0_6 = arith.constant 0 : index
    %c59 = arith.constant 59 : index
    %6 = vector.load %arg2[%c0_6, %c59] : memref<24x128xf32, #tpu.memory_space<vmem>>, vector<24x1xf32>
    %c0_7 = arith.constant 0 : index
    %c60 = arith.constant 60 : index
    %7 = vector.load %arg2[%c0_7, %c60] : memref<24x128xf32, #tpu.memory_space<vmem>>, vector<1x1xf32>
    %c0_8 = arith.constant 0 : index
    %c0_9 = arith.constant 0 : index
    %8 = vector.load %arg1[%c0_8, %c0_9] : memref<8x1024xf32, #tpu.memory_space<vmem>>, vector<1x1024xf32>
    %c1 = arith.constant 1 : index
    %c0_10 = arith.constant 0 : index
    %9 = vector.load %arg1[%c1, %c0_10] : memref<8x1024xf32, #tpu.memory_space<vmem>>, vector<1x1024xf32>
    %10 = vector.extract_strided_slice %0 {offsets = [0, 0], sizes = [24, 1], strides = [1, 1]} : vector<24x8xf32> to vector<24x1xf32>
    %11 = vector.broadcast %10 : vector<24x1xf32> to vector<24x1024xf32>
    %12 = vector.broadcast %8 : vector<1x1024xf32> to vector<24x1024xf32>
    %13 = arith.mulf %11, %12 : vector<24x1024xf32>
    %14 = vector.extract_strided_slice %0 {offsets = [0, 1], sizes = [24, 1], strides = [1, 1]} : vector<24x8xf32> to vector<24x1xf32>
    %15 = vector.broadcast %14 : vector<24x1xf32> to vector<24x1024xf32>
    %16 = vector.broadcast %9 : vector<1x1024xf32> to vector<24x1024xf32>
    %17 = arith.mulf %15, %16 : vector<24x1024xf32>
    %18 = arith.addf %13, %17 : vector<24x1024xf32>
    %19 = vector.broadcast %4 : vector<24x1xf32> to vector<24x1024xf32>
    %20 = arith.addf %18, %19 : vector<24x1024xf32>
    %21 = math.tanh %20 : vector<24x1024xf32>
    %cst = arith.constant dense<0.000000e+00> : vector<24x1024xf32>
    %22 = tpu.matmul %1, %21, %cst {dimension_numbers = #tpu.dot_dimension_numbers<[1], [0], [0], [1], [0, 0, 1, 1], [], []>} : vector<24x24xf32>, vector<24x1024xf32>, vector<24x1024xf32> -> vector<24x1024xf32>
    %23 = vector.broadcast %5 : vector<24x1xf32> to vector<24x1024xf32>
    %24 = arith.addf %22, %23 : vector<24x1024xf32>
    %25 = math.tanh %24 : vector<24x1024xf32>
    %cst_11 = arith.constant dense<0.000000e+00> : vector<24x1024xf32>
    %26 = tpu.matmul %2, %25, %cst_11 {dimension_numbers = #tpu.dot_dimension_numbers<[1], [0], [0], [1], [0, 0, 1, 1], [], []>} : vector<24x24xf32>, vector<24x1024xf32>, vector<24x1024xf32> -> vector<24x1024xf32>
    %27 = vector.broadcast %6 : vector<24x1xf32> to vector<24x1024xf32>
    %28 = arith.addf %26, %27 : vector<24x1024xf32>
    %29 = math.tanh %28 : vector<24x1024xf32>
    %30 = vector.broadcast %3 : vector<24x1xf32> to vector<24x1024xf32>
    %31 = arith.mulf %30, %29 : vector<24x1024xf32>
    %cst_12 = arith.constant dense<0.000000e+00> : vector<1024xf32>
    %32 = vector.multi_reduction <add>, %31, %cst_12 [0] : vector<24x1024xf32> to vector<1024xf32>
    %33 = vector.shape_cast %32 : vector<1024xf32> to vector<1x1024xf32>
    %34 = vector.broadcast %7 : vector<1x1xf32> to vector<1x1024xf32>
    %35 = arith.addf %33, %34 : vector<1x1024xf32>
    %c0_13 = arith.constant 0 : index
    %c0_14 = arith.constant 0 : index
    %36 = vector.load %arg3[%c0_13, %c0_14] : memref<1x1024xf32, #tpu.memory_space<vmem>>, vector<1x1024xf32>
    tpu.vector_store %arg3[%c0_13, %c0_14], %35 {strides = array<i32>} : memref<1x1024xf32, #tpu.memory_space<vmem>>, vector<1x1024xf32>,
    return
  }
  func.func @transform_0(%arg0: i32) -> (i32, i32) {
    %c0_i32 = arith.constant 0 : i32
    %c0_i32_0 = arith.constant 0 : i32
    return %c0_i32, %arg0 : i32, i32
  }
  func.func @transform_1(%arg0: i32) -> (i32, i32) {
    %c0_i32 = arith.constant 0 : i32
    %c0_i32_0 = arith.constant 0 : i32
    %c0_i32_1 = arith.constant 0 : i32
    return %c0_i32, %c0_i32_0 : i32, i32
  }
  func.func @transform_2(%arg0: i32) -> (i32, i32) {
    %c0_i32 = arith.constant 0 : i32
    %c0_i32_0 = arith.constant 0 : i32
    return %c0_i32, %arg0 : i32, i32
  }
}

</mosaic_0001>

<bundles_post_ra>
// kernel: _pinn_forward_impl.1
= control target key start
LH: loop header
LB: loop body
LE: loop exit
PB: predicated region body
PF: predicated region fallthrough
CT: control target
= control target key end

     0   :  { %v1396_v0 = vmov 0   ;;  %v1397_v3 = vmov 1   ;;  %v1398_v5 = vmov 57   ;;  %s1399_s15 = smov 120   ;;  %v1400_v6 = vmov 0.0   ;;  %s1402_s16 = smov 96   ;;  %s1744_s1 = inlined_call_operand.vmem [shape: f32[24,128], index: 1, kind: input, shape index: {}]   ;;  %s1745_s0 = inlined_call_operand.vmem [shape: f32[8,1024], index: 0, kind: input, shape index: {}]   ;;  %s1746_s2 = inlined_call_operand.vmem [shape: f32[1,1024], index: 2, kind: output, shape index: {}]  }
   0x1   :  { %1239 = vset.pattern.permute.xlu1 %v1396_v0  ;;  %1237 = vset.pattern.permute.xlu0 %v1396_v0  ;;  %v1425_v1 = vld [vmem:[%s1744_s1 + $0x10] sm:$0xff]  ;;  %v1430_v2 = vld [vmem:[%s1744_s1 + $0x8] sm:$0xff]  ;;  %v1439_v4 = vld [vmem:[%s1744_s1] sm:$0xff]  ;;  %v1401_v7 = vmov 58   ;;  %v38_v8 = vlaneseq  ;;  %vm281_vm0 = vcmask 195584  }
   0x2   :  { %34 = vperm.xlu0 %1237, %v1425_v1   ;;  %29 = vperm.xlu1 %1239, %v1430_v2   ;;  %v15_v12 = vld [vmem:[%s1745_s0] ss:$8 sm:$0xf]  ;;  %v1200_v15 = vld [vmem:[%s1745_s0 + $0x1] ss:$8 sm:$0xf] }
   0x3   :  { %352 = vmatprep.mubr.f32.mxu0 %v1400_v6  ;;  %435 = vmatprep.mubr.f32.mxu1 %v1400_v6  ;;  %v1457_v11 = vshrl.u32 %v38_v8, 7  ;;  %v16_v13 = vld [vmem:[%s1745_s0] ss:$8 sm:$0xf0] }
   0x4   :  { %v1201_v16 = vld [vmem:[%s1745_s0 + $0x1] ss:$8 sm:$0xf0]  ;;  %v17_v21 = vor.u32 %v16_v13, %v15_v12 }
   0x5   :  { %v40_v17 = vsub.s32 0, %v1457_v11  ;;  %v48_v18 = vsub.s32 2, %v1457_v11  ;;  %v56_v19 = vsub.s32 4, %v1457_v11  ;;  %v60_v20 = vsub.s32 5, %v1457_v11 }
   0x6   :  { %1238 = vset.pattern.permute.xlu0 %v1397_v3  ;;  %1240 = vset.pattern.permute.xlu1 %v1397_v3  ;;  %v64_v23 = vsub.s32 6, %v1457_v11  ;;  %v68_v24 = vsub.s32 7, %v1457_v11  ;;  %v21_v25 = vor.u32 %v1201_v16, %v1200_v15  ;;  %v44_v27 = vsub.s32 1, %v1457_v11 }
   0x7   :  { %111 = vperm.xlu0 %1238, %v1425_v1   ;;  %107 = vperm.xlu1 %1240, %v1430_v2   ;;  %v52_v28 = vsub.s32 3, %v1457_v11  ;;  %v41_v29 = vrot.slane %v17_v21, %v40_v17  ;;  %v1485_v30 = vrot.slane %v17_v21, %v48_v18  ;;  %v1487_v31 = vrot.slane %v17_v21, %v56_v19 }
   0x8   :  { %v1489_v32 = vrot.slane %v17_v21, %v60_v20  ;;  %v1491_v33 = vrot.slane %v17_v21, %v64_v23  ;;  %v1493_v34 = vrot.slane %v17_v21, %v68_v24  ;;  %v1495_v35 = vrot.slane %v21_v25, %v56_v19 }
   0x9   :  { %v118_v36 = vrot.slane %v21_v25, %v40_v17  ;;  %v1497_v37 = vrot.slane %v21_v25, %v60_v20  ;;  %v1499_v38 = vrot.slane %v21_v25, %v64_v23  ;;  %v1501_v39 = vrot.slane %v21_v25, %v68_v24 }
   0xa   :  { %v126_v40 = vrot.slane %v21_v25, %v48_v18  ;;  %v45_v42 = vrot.slane %v17_v21, %v44_v27  ;;  %v122_v43 = vrot.slane %v21_v25, %v44_v27  ;;  %v53_v44 = vrot.slane %v17_v21, %v52_v28 }
   0xb   :  { %1241 = vset.pattern.permute.xlu1 %v1396_v0  ;;  %103 = vperm.xlu0 %1238, %v1439_v4   ;;  %v130_v45 = vrot.slane %v21_v25, %v52_v28 }
   0xc   :  { %24 = vperm.xlu1 %1241, %v1439_v4  }
   0xf   :  { %1243 = vset.pattern.permute.xlu0 %v1398_v5 }
  0x10   :  { %208 = vperm.xlu0 %1243, %v1430_v2   ;;  %1242 = vset.pattern.permute.xlu1 %v1398_v5 }
  0x11   :  { %212 = vperm.xlu1 %1242, %v1425_v1  }
  0x14   :  { %277 = vrot.lane.b32.xlu0 %v1430_v2, %s1399_s15 }
  0x15   :  { %204 = vperm.xlu1 %1242, %v1439_v4   ;;  %1244 = vset.pattern.permute.xlu0 %v1401_v7 }
  0x18   :  { %272 = vperm.xlu0 %1244, %v1425_v1  }
  0x19   :  { %275 = vrot.lane.b32.xlu1 %v1439_v4, %s1399_s15 }
  0x1a   :  { %1245 = vset.pattern.permute.xlu1 %v1401_v7 }
  0x1c   :  { %656 = vrot.lane.b32.xlu0 %v1439_v4, %s1402_s16 }
  0x1d   :  { %279 = vrot.lane.b32.xlu1 %v1425_v1, %s1399_s15 }
  0x20   :  { %660 = vrot.lane.b32.xlu0 %v1425_v1, %s1402_s16 }
  0x21   :  { %268 = vperm.xlu1 %1245, %v1430_v2  }
  0x25   :  { %264 = vperm.xlu1 %1245, %v1439_v4  }
  0x29   :  { %658 = vrot.lane.b32.xlu1 %v1430_v2, %s1402_s16 }
  0x7d   :  { %v30_v9 = vpop.permute.xlu1 %29  ;;  %v35_v10 = vpop.permute.xlu0 %34 }
  0x7e   :  { %v86_v46 = vmul.f32 %v41_v29, %v30_v9  ;;  %v88_v47 = vmul.f32 %v1485_v30, %v30_v9  ;;  %v90_v48 = vmul.f32 %v1487_v31, %v30_v9  ;;  %v1508_v49 = vmul.f32 %v1489_v32, %v30_v9 }
  0x7f   :  { %v1511_v50 = vmul.f32 %v1491_v33, %v30_v9  ;;  %v1514_v51 = vmul.f32 %v1493_v34, %v30_v9  ;;  %v1517_v52 = vmul.f32 %v1487_v31, %v35_v10  ;;  %v1523_v55 = vmul.f32 %v1489_v32, %v35_v10 }
  0x80   :  { %v1526_v56 = vmul.f32 %v1491_v33, %v35_v10  ;;  %v1529_v57 = vmul.f32 %v1493_v34, %v35_v10  ;;  %v87_v60 = vmul.f32 %v45_v42, %v30_v9  ;;  %v95_v61 = vmul.f32 %v45_v42, %v35_v10 }
  0x81   :  { %v89_v62 = vmul.f32 %v53_v44, %v30_v9  ;;  %v97_v5 = vmul.f32 %v53_v44, %v35_v10  ;;  %v94_v7 = vmul.f32 %v41_v29, %v35_v10  ;;  %v96_v15 = vmul.f32 %v1485_v30, %v35_v10 }
  0x82   :  { %v1465_v14 = vpop.permute.xlu1 %107  ;;  %v1477_v22 = vpop.permute.xlu0 %111 }
  0x83   :  { %v163_v53 = vmul.f32 %v118_v36, %v1465_v14  ;;  %v165_v58 = vmul.f32 %v126_v40, %v1465_v14  ;;  %v167_v59 = vmul.f32 %v1495_v35, %v1465_v14  ;;  %v175_v16 = vmul.f32 %v1495_v35, %v1477_v22 }
  0x84   :  { %v176_v9 = vmul.f32 %v1497_v37, %v1477_v22  ;;  %v172_v18 = vmul.f32 %v122_v43, %v1477_v22  ;;  %v177_v19 = vmul.f32 %v1499_v38, %v1477_v22  ;;  %v164_v24 = vmul.f32 %v122_v43, %v1465_v14 }
  0x85   :  { %v187_v8 = vadd.f32 %v163_v53, %v86_v46  ;;  %v189_v17 = vadd.f32 %v165_v58, %v88_v47  ;;  %v191_v20 = vadd.f32 %v167_v59, %v90_v48  ;;  %v174_v47 = vmul.f32 %v130_v45, %v1477_v22 }
  0x86   :  { %v1503_v41 = vpop.permute.xlu0 %103  ;;  %v171_v58 = vmul.f32 %v118_v36, %v1477_v22  ;;  %v188_v59 = vadd.f32 %v164_v24, %v87_v60 }
  0x87   :  { %v1481_v26 = vpop.permute.xlu1 %24  ;;  %v155_v63 = vmul.f32 %v118_v36, %v1503_v41  ;;  %v156_v13 = vmul.f32 %v122_v43, %v1503_v41  ;;  %v158_v28 = vmul.f32 %v130_v45, %v1503_v41  ;;  %v157_v48 = vmul.f32 %v126_v40, %v1503_v41 }
  0x88   :  { %v78_v0 = vmul.f32 %v41_v29, %v1481_v26  ;;  %v79_v12 = vmul.f32 %v45_v42, %v1481_v26  ;;  %v81_v27 = vmul.f32 %v53_v44, %v1481_v26  ;;  %v178_v29 = vmul.f32 %v1501_v39, %v1477_v22 }
  0x89   :  { %v196_v43 = vadd.f32 %v172_v18, %v95_v61  ;;  %v168_v36 = vmul.f32 %v1497_v37, %v1465_v14 }
  0x8a   :  { %v179_v25 = vadd.f32 %v155_v63, %v78_v0  ;;  %v180_v46 = vadd.f32 %v156_v13, %v79_v12  ;;  %v173_v63 = vmul.f32 %v126_v40, %v1477_v22  ;;  %v182_v12 = vadd.f32 %v158_v28, %v81_v27 }
  0x8b   :  { %v1536_v3 = vpop.permute.xlu0 %208  ;;  %v80_v13 = vmul.f32 %v1485_v30, %v1481_v26  ;;  %v195_v22 = vadd.f32 %v171_v58, %v94_v7  ;;  %v169_v40 = vmul.f32 %v1499_v38, %v1465_v14  ;;  %v170_v30 = vmul.f32 %v1501_v39, %v1465_v14 }
  0x8c   :  { %v1520_v54 = vpop.permute.xlu1 %212  ;;  %v223_v21 = vadd.f32 %v1536_v3, %v187_v8  ;;  %v225_v10 = vadd.f32 %v1536_v3, %v189_v17  ;;  %v227_v42 = vadd.f32 %v1536_v3, %v191_v20  ;;  %v166_v8 = vmul.f32 %v130_v45, %v1465_v14 }
  0x8d   :  { %v232_v0 = vadd.f32 %v1520_v54, %v196_v43  ;;  %v224_v61 = vadd.f32 %v1536_v3, %v188_v59  ;;  %v198_v17 = vadd.f32 %v174_v47, %v97_v5  ;;  %v197_v18 = vadd.f32 %v173_v63, %v96_v15 }
  0x8e   :  { %1252 = vtanh.f32 %v223_v21  ;;  %v190_v20 = vadd.f32 %v166_v8, %v89_v62  ;;  %v231_v5 = vadd.f32 %v1520_v54, %v195_v22  ;;  %v199_v21 = vadd.f32 %v175_v16, %v1517_v52 }
  0x8f   :  { %1254 = vtanh.f32 %v225_v10  ;;  %v234_v45 = vadd.f32 %v1520_v54, %v198_v17  ;;  %v181_v24 = vadd.f32 %v157_v48, %v80_v13  ;;  %v233_v7 = vadd.f32 %v1520_v54, %v197_v18 }
  0x90   :  { %v1549_v23 = vpop.permute.xlu1 %204  ;;  %1256 = vtanh.f32 %v227_v42  ;;  %v192_v10 = vadd.f32 %v168_v36, %v1508_v49  ;;  %v226_v27 = vadd.f32 %v1536_v3, %v190_v20  ;;  %v159_v14 = vmul.f32 %v1495_v35, %v1503_v41 }
  0x91   :  { %v215_v53 = vadd.f32 %v1549_v23, %v179_v25  ;;  %v216_v44 = vadd.f32 %v1549_v23, %v180_v46  ;;  %v218_v60 = vadd.f32 %v1549_v23, %v182_v12  ;;  %v200_v25 = vadd.f32 %v176_v9, %v1523_v55 }
  0x92   :  { %v160_v62 = vmul.f32 %v1497_v37, %v1503_v41  ;;  %v217_v15 = vadd.f32 %v1549_v23, %v181_v24  ;;  %v161_v52 = vmul.f32 %v1499_v38, %v1503_v41  ;;  %v162_v49 = vmul.f32 %v1501_v39, %v1503_v41 }
  0x93   :  { %1258 = vtanh.f32 %v215_v53  ;;  %v228_v55 = vadd.f32 %v1536_v3, %v192_v10  ;;  %v82_v16 = vmul.f32 %v1487_v31, %v1481_v26  ;;  %v202_v35 = vadd.f32 %v178_v29, %v1529_v57 }
  0x94   :  { %1260 = vtanh.f32 %v216_v44  ;;  %v235_v9 = vadd.f32 %v1520_v54, %v199_v21  ;;  %v83_v37 = vmul.f32 %v1489_v32, %v1481_v26  ;;  %v201_v28 = vadd.f32 %v177_v19, %v1526_v56 }
  0x95   :  { %1262 = vtanh.f32 %v232_v0  ;;  %v236_v38 = vadd.f32 %v1520_v54, %v200_v25  ;;  %v85_v39 = vmul.f32 %v1493_v34, %v1481_v26  ;;  %v194_v41 = vadd.f32 %v170_v30, %v1514_v51 }
  0x96   :  { %1264 = vtanh.f32 %v224_v61  ;;  %v238_v31 = vadd.f32 %v1520_v54, %v202_v35  ;;  %v84_v29 = vmul.f32 %v1491_v33, %v1481_v26  ;;  %v193_v42 = vadd.f32 %v169_v40, %v1511_v50  ;;  %v276_v61 = vpop.permute.xlu1 %275 }
  0x97   :  { %1266 = vtanh.f32 %v218_v60  ;;  %v237_v32 = vadd.f32 %v1520_v54, %v201_v28  ;;  %v230_v19 = vadd.f32 %v1536_v3, %v194_v41  ;;  %v183_v46 = vadd.f32 %v159_v14, %v82_v16 }
  0x98   :  { %1268 = vtanh.f32 %v234_v45  ;;  %v229_v51 = vadd.f32 %v1536_v3, %v193_v42  ;;  %v184_v47 = vadd.f32 %v160_v62, %v83_v37  ;;  %v186_v53 = vadd.f32 %v162_v49, %v85_v39  ;;  %v278_v45 = vpop.permute.xlu0 %277 }
  0x99   :  { %1270 = vtanh.f32 %v231_v5  ;;  %v219_v26 = vadd.f32 %v1549_v23, %v183_v46  ;;  %v185_v50 = vadd.f32 %v161_v52, %v84_v29  ;;  %v1404_v10 = vmov 56  }
  0x9a   :  { %1272 = vtanh.f32 %v233_v7  ;;  %v220_v54 = vadd.f32 %v1549_v23, %v184_v47  ;;  %v222_v58 = vadd.f32 %v1549_v23, %v186_v53  ;;  %v280_v21 = vpop.permute.xlu1 %279  ;;  %v1403_v7 = vmov 59  }
  0x9b   :  { %1274 = vtanh.f32 %v226_v27  ;;  %v1253_v57 = vpop.eup %1252  ;;  %v221_v3 = vadd.f32 %v1549_v23, %v185_v50  ;;  %1246 = vset.pattern.permute.xlu1 %v1403_v7  ;;  %1247 = vset.pattern.permute.xlu0 %v1403_v7  ;;  %v1405_v25 = vmov 60   ;;  %v14_v27 = vld [vmem:[%s1744_s1] sm:$0x1] }
  0x9c   :  { %1276 = vtanh.f32 %v217_v15  ;;  %v1255_v56 = vpop.eup %1254  ;;  %645 = vperm.xlu1 %1246, %v1439_v4   ;;  %649 = vperm.xlu0 %1247, %v1430_v2   ;;  %v273_v37 = vpop.permute.xlu0 %272 }
  0x9d   :  { %1278 = vtanh.f32 %v228_v55  ;;  %v1257_v34 = vpop.eup %1256 }
  0x9e   :  { %1280 = vtanh.f32 %v235_v9  ;;  %v1648_v14 = vpop.permute.xlu1 %268 }
  0x9f   :  { %1282 = vtanh.f32 %v236_v38 }
  0xa0   :  { %v1259_v48 = vpop.eup %1258  ;;  %1284 = vtanh.f32 %v238_v31  ;;  %653 = vperm.xlu1 %1246, %v1425_v1   ;;  %1249 = vset.pattern.permute.xlu0 %v1404_v10 }
  0xa1   :  { %v1261_v33 = vpop.eup %1260  ;;  %1286 = vtanh.f32 %v237_v32  ;;  %1029 = vperm.xlu0 %1249, %v1430_v2  }
  0xa2   :  { %v1263_v43 = vpop.eup %1262  ;;  %1288 = vtanh.f32 %v230_v19  ;;  %v1650_v49 = vpop.permute.xlu1 %264 }
  0xa3   :  { %v1265_v59 = vpop.eup %1264  ;;  %1290 = vtanh.f32 %v229_v51  ;;  %314 = vmatprep.subr.mxu0 %v1263_v43 }
  0xa4   :  { %v1267_v44 = vpop.eup %1266  ;;  %1292 = vtanh.f32 %v219_v26  ;;  %1248 = vset.pattern.permute.xlu1 %v1404_v10 }
  0xa5   :  { %v1269_v63 = vpop.eup %1268  ;;  %1294 = vtanh.f32 %v220_v54  ;;  %1025 = vperm.xlu1 %1248, %v1439_v4   ;;  %1251 = vset.pattern.permute.xlu0 %v1405_v25 }
  0xa6   :  { %v1271_v0 = vpop.eup %1270  ;;  %1296 = vtanh.f32 %v222_v58  ;;  %397 = vmatprep.subr.mxu1 %v1269_v63 }
  0xa7   :  { %v1273_v8 = vpop.eup %1272  ;;  %1298 = vtanh.f32 %v221_v3  ;;  %315 = vmatpush1.msra.mxu0 %v1271_v0 }
  0xa8   :  { %v1275_v12 = vpop.eup %1274  ;;  %398 = vmatpush1.msra.mxu1 %v1273_v8  ;;  %316 = vmatprep.subr.mxu0 %v1265_v59 }
  0xa9   :  { %v1277_v13 = vpop.eup %1276  ;;  %399 = vmatprep.subr.mxu1 %v1275_v12  ;;  %317 = vmatpush1.msra.mxu0 %v1253_v57 }
  0xaa   :  { %v1279_v23 = vpop.eup %1278  ;;  %400 = vmatpush1.msra.mxu1 %v1255_v56  ;;  %318 = vmatprep.subr.mxu0 %v1261_v33 }
  0xab   :  { %v1281_v17 = vpop.eup %1280  ;;  %401 = vmatprep.subr.mxu1 %v1267_v44  ;;  %319 = vmatpush1.msra.mxu0 %v1259_v48 }
  0xac   :  { %v1283_v36 = vpop.eup %1282  ;;  %402 = vmatpush1.msra.mxu1 %v1277_v13  ;;  %1202 = vmatmul.mubr.msk.f32.vlgmr.msra.gmra.mxu0 %vm281_vm0, %v276_v61 }
  0xad   :  { %v1285_v60 = vpop.eup %1284  ;;  %1205 = vmatmul.mubr.msk.f32.vlgmr.msra.gmra.mxu1 %vm281_vm0, %v276_v61  ;;  %480 = vmatprep.subr.mxu0 %v1283_v36 }
  0xae   :  { %v1287_v22 = vpop.eup %1286  ;;  %563 = vmatprep.subr.mxu1 %v1285_v60  ;;  %481 = vmatpush1.msra.mxu0 %v1281_v17 }
  0xaf   :  { %v1289_v40 = vpop.eup %1288  ;;  %564 = vmatpush1.msra.mxu1 %v1287_v22  ;;  %482 = vmatprep.subr.mxu0 %v1279_v23 }
  0xb0   :  { %v1291_v18 = vpop.eup %1290  ;;  %565 = vmatprep.subr.mxu1 %v1289_v40  ;;  %358 = vmatprep.mubr.f32.mxu0 %v1400_v6 }
  0xb1   :  { %v1293_v30 = vpop.eup %1292  ;;  %441 = vmatprep.mubr.f32.mxu1 %v1400_v6  ;;  %483 = vmatpush1.msra.mxu0 %v1257_v34 }
  0xb2   :  { %v1295_v20 = vpop.eup %1294  ;;  %566 = vmatpush1.msra.mxu1 %v1291_v18  ;;  %1203 = vmatmul.mubr.msk.f32.gmra.mxu0 %vm281_vm0, %v278_v45 }
  0xb3   :  { %v1297_v5 = vpop.eup %1296  ;;  %1206 = vmatmul.mubr.msk.f32.gmra.mxu1 %vm281_vm0, %v278_v45  ;;  %484 = vmatprep.subr.mxu0 %v1295_v20 }
  0xb4   :  { %v1299_v24 = vpop.eup %1298  ;;  %567 = vmatprep.subr.mxu1 %v1297_v5  ;;  %485 = vmatpush1.msra.mxu0 %v1293_v30 }
  0xb5   :  { %568 = vmatpush1.msra.mxu1 %v1299_v24  ;;  %364 = vmatprep.mubr.f32.mxu0 %v1400_v6 }
  0xb6   :  { %447 = vmatprep.mubr.f32.mxu1 %v1400_v6  ;;  %1204 = vmatmul.mubr.msk.f32.gmra.mxu0 %vm281_vm0, %v280_v21 }
  0xb7   :  { %1207 = vmatmul.mubr.msk.f32.gmra.mxu1 %vm281_vm0, %v280_v21  ;;  %518 = vmatprep.mubr.f32.mxu0 %v1400_v6 }
  0xb8   :  { %601 = vmatprep.mubr.f32.mxu1 %v1400_v6  ;;  %1033 = vperm.xlu1 %1248, %v1425_v1  }
  0xba   :  { %1208 = vmatmul.mubr.msk.f32.vlgmr.msra.gmra.mxu0 %vm281_vm0, %v276_v61 }
  0xbb   :  { %1211 = vmatmul.mubr.msk.f32.vlgmr.msra.gmra.mxu1 %vm281_vm0, %v276_v61  ;;  %524 = vmatprep.mubr.f32.mxu0 %v1400_v6 }
  0xbc   :  { %607 = vmatprep.mubr.f32.mxu1 %v1400_v6  ;;  %1250 = vset.pattern.permute.xlu1 %v1405_v25 }
  0xbd   :  { %1126 = vperm.xlu1 %1250, %v14_v27   ;;  %v657_v27 = vpop.permute.xlu0 %656 }
  0xbe   :  { %1209 = vmatmul.mubr.msk.f32.gmra.mxu0 %vm281_vm0, %v278_v45 }
  0xbf   :  { %1212 = vmatmul.mubr.msk.f32.gmra.mxu1 %vm281_vm0, %v278_v45  ;;  %530 = vmatprep.mubr.f32.mxu0 %v1400_v6 }
  0xc0   :  { %613 = vmatprep.mubr.f32.mxu1 %v1400_v6 }
  0xc2   :  { %1210 = vmatmul.mubr.msk.f32.gmra.mxu0 %vm281_vm0, %v280_v21 }
  0xc3   :  { %1213 = vmatmul.mubr.msk.f32.gmra.mxu1 %vm281_vm0, %v280_v21  ;;  %732 = vmatprep.mubr.f32.mxu0 %v1400_v6 }
  0xc4   :  { %815 = vmatprep.mubr.f32.mxu1 %v1400_v6 }
 0x16c   :  { %v354_v62 = vpop.f32.mrf.mxu0 }
 0x16d   :  { %v437_v15 = vpop.f32.mrf.mxu1  ;;  %v355_v4 = vadd.f32 %v354_v62, %v1650_v49 }
 0x16e   :  { %v356_v52 = vpop.f32.mrf.mxu0  ;;  %v438_v53 = vadd.f32 %v437_v15, %v1650_v49 }
 0x16f   :  { %v439_v2 = vpop.f32.mrf.mxu1  ;;  %v357_v16 = vadd.f32 %v356_v52, %v1650_v49  ;;  %1300 = vtanh.f32 %v355_v4  ;;  %v659_v52 = vpop.permute.xlu1 %658 }
 0x170   :  { %v440_v47 = vadd.f32 %v439_v2, %v1650_v49 }
 0x171   :  { %1302 = vtanh.f32 %v357_v16  ;;  %v661_v16 = vpop.permute.xlu0 %660 }
 0x172   :  { %v360_v55 = vpop.f32.mrf.mxu0 }
 0x173   :  { %v443_v1 = vpop.f32.mrf.mxu1  ;;  %v361_v35 = vadd.f32 %v360_v55, %v1648_v14 }
 0x174   :  { %v362_v9 = vpop.f32.mrf.mxu0  ;;  %v444_v34 = vadd.f32 %v443_v1, %v1648_v14 }
 0x175   :  { %v363_v28 = vadd.f32 %v362_v9, %v1648_v14  ;;  %v445_v38 = vpop.f32.mrf.mxu1  ;;  %1304 = vtanh.f32 %v361_v35 }
 0x176   :  { %v366_v39 = vpop.f32.mrf.mxu0  ;;  %v446_v56 = vadd.f32 %v445_v38, %v1648_v14 }
 0x177   :  { %v367_v41 = vadd.f32 %v366_v39, %v273_v37  ;;  %v449_v31 = vpop.f32.mrf.mxu1  ;;  %1306 = vtanh.f32 %v363_v28 }
 0x178   :  { %v368_v57 = vpop.f32.mrf.mxu0  ;;  %v450_v29 = vadd.f32 %v449_v31, %v273_v37 }
 0x179   :  { %v369_v42 = vadd.f32 %v368_v57, %v273_v37  ;;  %v451_v32 = vpop.f32.mrf.mxu1  ;;  %1308 = vtanh.f32 %v367_v41  ;;  %v646_v41 = vpop.permute.xlu1 %645 }
 0x17a   :  { %v452_v19 = vadd.f32 %v451_v32, %v273_v37  ;;  %v520_v46 = vpop.f32.mrf.mxu0 }
 0x17b   :  { %1310 = vtanh.f32 %v369_v42  ;;  %v603_v51 = vpop.f32.mrf.mxu1  ;;  %v521_v50 = vadd.f32 %v520_v46, %v1650_v49 }
 0x17c   :  { %1312 = vtanh.f32 %v452_v19  ;;  %v522_v48 = vpop.f32.mrf.mxu0  ;;  %v1301_v63 = vpop.eup %1300  ;;  %v604_v7 = vadd.f32 %v603_v51, %v1650_v49 }
 0x17d   :  { %1314 = vtanh.f32 %v450_v29  ;;  %v605_v26 = vpop.f32.mrf.mxu1  ;;  %v523_v43 = vadd.f32 %v522_v48, %v1650_v49 }
 0x17e   :  { %1316 = vtanh.f32 %v446_v56  ;;  %v526_v33 = vpop.f32.mrf.mxu0  ;;  %v1303_v12 = vpop.eup %1302  ;;  %v606_v21 = vadd.f32 %v605_v26, %v1650_v49 }
 0x17f   :  { %1318 = vtanh.f32 %v444_v34  ;;  %v609_v54 = vpop.f32.mrf.mxu1  ;;  %v527_v59 = vadd.f32 %v526_v33, %v1648_v14  ;;  %v1690_v56 = vpop.permute.xlu0 %649 }
 0x180   :  { %1320 = vtanh.f32 %v440_v47  ;;  %v528_v58 = vpop.f32.mrf.mxu0  ;;  %v610_v20 = vadd.f32 %v609_v54, %v1648_v14  ;;  %v1694_v26 = vpop.permute.xlu1 %653 }
 0x181   :  { %1322 = vtanh.f32 %v438_v53  ;;  %v611_v3 = vpop.f32.mrf.mxu1  ;;  %v529_v22 = vadd.f32 %v528_v58, %v1648_v14 }
 0x182   :  { %v532_v44 = vpop.f32.mrf.mxu0  ;;  %1324 = vtanh.f32 %v521_v50  ;;  %v1305_v61 = vpop.eup %1304  ;;  %v612_v18 = vadd.f32 %v611_v3, %v1648_v14 }
 0x183   :  { %v533_v0 = vadd.f32 %v532_v44, %v273_v37  ;;  %v615_v8 = vpop.f32.mrf.mxu1  ;;  %1326 = vtanh.f32 %v523_v43 }
 0x184   :  { %v534_v13 = vpop.f32.mrf.mxu0  ;;  %1328 = vtanh.f32 %v527_v59  ;;  %v616_v23 = vadd.f32 %v615_v8, %v273_v37  ;;  %v1307_v60 = vpop.eup %1306 }
 0x185   :  { %v535_v17 = vadd.f32 %v534_v13, %v273_v37  ;;  %v617_v36 = vpop.f32.mrf.mxu1  ;;  %1330 = vtanh.f32 %v533_v0 }
 0x186   :  { %v618_v40 = vadd.f32 %v617_v36, %v273_v37  ;;  %v1309_v45 = vpop.eup %1308 }
 0x187   :  { %1332 = vtanh.f32 %v535_v17 }
 0x188   :  { %v1311_v30 = vpop.eup %1310  ;;  %1334 = vtanh.f32 %v618_v40 }
 0x189   :  { %v1313_v5 = vpop.eup %1312  ;;  %1336 = vtanh.f32 %v616_v23  ;;  %694 = vmatprep.subr.mxu0 %v1311_v30 }
 0x18a   :  { %v1315_v24 = vpop.eup %1314  ;;  %1338 = vtanh.f32 %v529_v22  ;;  %777 = vmatprep.subr.mxu1 %v1313_v5  ;;  %695 = vmatpush1.msra.mxu0 %v1309_v45  ;;  %v1702_v45 = vpop.permute.xlu1 %1025 }
 0x18b   :  { %v1317_v10 = vpop.eup %1316  ;;  %1340 = vtanh.f32 %v612_v18  ;;  %778 = vmatpush1.msra.mxu1 %v1315_v24  ;;  %696 = vmatprep.subr.mxu0 %v1307_v60  ;;  %v1704_v5 = vpop.permute.xlu0 %1029 }
 0x18c   :  { %v1319_v25 = vpop.eup %1318  ;;  %1342 = vtanh.f32 %v610_v20  ;;  %779 = vmatprep.subr.mxu1 %v1317_v10  ;;  %697 = vmatpush1.msra.mxu0 %v1305_v61 }
 0x18d   :  { %v1321_v14 = vpop.eup %1320  ;;  %1344 = vtanh.f32 %v606_v21  ;;  %780 = vmatpush1.msra.mxu1 %v1319_v25  ;;  %698 = vmatprep.subr.mxu0 %v1303_v12 }
 0x18e   :  { %v1323_v62 = vpop.eup %1322  ;;  %1346 = vtanh.f32 %v604_v7  ;;  %781 = vmatprep.subr.mxu1 %v1321_v14  ;;  %699 = vmatpush1.msra.mxu0 %v1301_v63 }
 0x18f   :  { %782 = vmatpush1.msra.mxu1 %v1323_v62  ;;  %1214 = vmatmul.mubr.msk.f32.vlgmr.msra.gmra.mxu0 %vm281_vm0, %v657_v27  ;;  %v1325_v15 = vpop.eup %1324 }
 0x190   :  { %1217 = vmatmul.mubr.msk.f32.vlgmr.msra.gmra.mxu1 %vm281_vm0, %v657_v27  ;;  %738 = vmatprep.mubr.f32.mxu0 %v1400_v6  ;;  %v1327_v49 = vpop.eup %1326 }
 0x191   :  { %821 = vmatprep.mubr.f32.mxu1 %v1400_v6  ;;  %v1329_v2 = vpop.eup %1328 }
 0x192   :  { %v1331_v4 = vpop.eup %1330 }
 0x193   :  { %1215 = vmatmul.mubr.msk.f32.gmra.mxu0 %vm281_vm0, %v659_v52 }
 0x194   :  { %v1333_v55 = vpop.eup %1332  ;;  %1218 = vmatmul.mubr.msk.f32.gmra.mxu1 %vm281_vm0, %v659_v52  ;;  %744 = vmatprep.mubr.f32.mxu0 %v1400_v6 }
 0x195   :  { %v1335_v1 = vpop.eup %1334  ;;  %860 = vmatprep.subr.mxu0 %v1333_v55  ;;  %827 = vmatprep.mubr.f32.mxu1 %v1400_v6 }
 0x196   :  { %v1337_v35 = vpop.eup %1336  ;;  %943 = vmatprep.subr.mxu1 %v1335_v1  ;;  %861 = vmatpush1.msra.mxu0 %v1331_v4 }
 0x197   :  { %v1339_v9 = vpop.eup %1338  ;;  %944 = vmatpush1.msra.mxu1 %v1337_v35  ;;  %1216 = vmatmul.mubr.msk.f32.gmra.mxu0 %vm281_vm0, %v661_v16  ;;  %v1714_v35 = vpop.permute.xlu1 %1033 }
 0x198   :  { %v1341_v37 = vpop.eup %1340  ;;  %1219 = vmatmul.mubr.msk.f32.gmra.mxu1 %vm281_vm0, %v661_v16  ;;  %862 = vmatprep.subr.mxu0 %v1339_v9 }
 0x199   :  { %v1343_v28 = vpop.eup %1342  ;;  %945 = vmatprep.subr.mxu1 %v1341_v37  ;;  %863 = vmatpush1.msra.mxu0 %v1329_v2 }
 0x19a   :  { %v1345_v38 = vpop.eup %1344  ;;  %946 = vmatpush1.msra.mxu1 %v1343_v28  ;;  %864 = vmatprep.subr.mxu0 %v1327_v49 }
 0x19b   :  { %v1347_v39 = vpop.eup %1346  ;;  %947 = vmatprep.subr.mxu1 %v1345_v38  ;;  %865 = vmatpush1.msra.mxu0 %v1325_v15 }
 0x19c   :  { %898 = vmatprep.mubr.f32.mxu0 %v1400_v6  ;;  %948 = vmatpush1.msra.mxu1 %v1347_v39 }
 0x19d   :  { %981 = vmatprep.mubr.f32.mxu1 %v1400_v6  ;;  %1220 = vmatmul.mubr.msk.f32.vlgmr.msra.gmra.mxu0 %vm281_vm0, %v657_v27 }
 0x19e   :  { %1223 = vmatmul.mubr.msk.f32.vlgmr.msra.gmra.mxu1 %vm281_vm0, %v657_v27  ;;  %904 = vmatprep.mubr.f32.mxu0 %v1400_v6 }
 0x19f   :  { %987 = vmatprep.mubr.f32.mxu1 %v1400_v6 }
 0x1a1   :  { %1221 = vmatmul.mubr.msk.f32.gmra.mxu0 %vm281_vm0, %v659_v52 }
 0x1a2   :  { %1224 = vmatmul.mubr.msk.f32.gmra.mxu1 %vm281_vm0, %v659_v52  ;;  %910 = vmatprep.mubr.f32.mxu0 %v1400_v6 }
 0x1a3   :  { %993 = vmatprep.mubr.f32.mxu1 %v1400_v6 }
 0x1a5   :  { %1222 = vmatmul.mubr.msk.f32.gmra.mxu0 %vm281_vm0, %v661_v16 }
 0x1a6   :  { %1225 = vmatmul.mubr.msk.f32.gmra.mxu1 %vm281_vm0, %v661_v16 }
 0x24f   :  { %v734_v31 = vpop.f32.mrf.mxu0 }
 0x250   :  { %v817_v57 = vpop.f32.mrf.mxu1  ;;  %v735_v29 = vadd.f32 %v734_v31, %v646_v41 }
 0x251   :  { %v736_v42 = vpop.f32.mrf.mxu0  ;;  %v818_v32 = vadd.f32 %v817_v57, %v646_v41 }
 0x252   :  { %v819_v19 = vpop.f32.mrf.mxu1  ;;  %v737_v46 = vadd.f32 %v736_v42, %v646_v41  ;;  %1348 = vtanh.f32 %v735_v29 }
 0x253   :  { %v820_v34 = vadd.f32 %v819_v19, %v646_v41  ;;  %1350 = vtanh.f32 %v818_v32  ;;  %v740_v51 = vpop.f32.mrf.mxu0 }
 0x254   :  { %1352 = vtanh.f32 %v737_v46  ;;  %v823_v6 = vpop.f32.mrf.mxu1  ;;  %v741_v47 = vadd.f32 %v740_v51, %v1690_v56 }
 0x255   :  { %1354 = vtanh.f32 %v820_v34  ;;  %v824_v48 = vadd.f32 %v823_v6, %v1690_v56  ;;  %v742_v53 = vpop.f32.mrf.mxu0 }
 0x256   :  { %1356 = vtanh.f32 %v741_v47  ;;  %v743_v33 = vadd.f32 %v742_v53, %v1690_v56  ;;  %v825_v50 = vpop.f32.mrf.mxu1 }
 0x257   :  { %1358 = vtanh.f32 %v824_v48  ;;  %v826_v54 = vadd.f32 %v825_v50, %v1690_v56  ;;  %v746_v43 = vpop.f32.mrf.mxu0 }
 0x258   :  { %1360 = vtanh.f32 %v743_v33  ;;  %v747_v58 = vadd.f32 %v746_v43, %v1694_v26  ;;  %v829_v59 = vpop.f32.mrf.mxu1 }
 0x259   :  { %1362 = vtanh.f32 %v826_v54  ;;  %v830_v3 = vadd.f32 %v829_v59, %v1694_v26  ;;  %v748_v44 = vpop.f32.mrf.mxu0 }
 0x25a   :  { %1364 = vtanh.f32 %v747_v58  ;;  %v749_v63 = vadd.f32 %v748_v44, %v1694_v26  ;;  %v831_v0 = vpop.f32.mrf.mxu1 }
 0x25b   :  { %1366 = vtanh.f32 %v830_v3  ;;  %v832_v8 = vadd.f32 %v831_v0, %v1694_v26 }
 0x25c   :  { %1368 = vtanh.f32 %v749_v63 }
 0x25d   :  { %1370 = vtanh.f32 %v832_v8  ;;  %v900_v12 = vpop.f32.mrf.mxu0 }
 0x25e   :  { %v901_v13 = vadd.f32 %v900_v12, %v646_v41  ;;  %v983_v61 = vpop.f32.mrf.mxu1 }
 0x25f   :  { %v1349_v23 = vpop.eup %1348  ;;  %v984_v17 = vadd.f32 %v983_v61, %v646_v41  ;;  %v902_v36 = vpop.f32.mrf.mxu0 }
 0x260   :  { %v1351_v60 = vpop.eup %1350  ;;  %1372 = vtanh.f32 %v901_v13  ;;  %v903_v22 = vadd.f32 %v902_v36, %v646_v41  ;;  %v985_v40 = vpop.f32.mrf.mxu1  ;;  %v1036_v52 = vmul.f32 %v1349_v23, %v1702_v45 }
 0x261   :  { %v1353_v18 = vpop.eup %1352  ;;  %1374 = vtanh.f32 %v984_v17  ;;  %v986_v30 = vadd.f32 %v985_v40, %v646_v41  ;;  %v906_v20 = vpop.f32.mrf.mxu0  ;;  %v1038_v16 = vmul.f32 %v1351_v60, %v1702_v45 }
 0x262   :  { %v1355_v21 = vpop.eup %1354  ;;  %1376 = vtanh.f32 %v903_v22  ;;  %v907_v24 = vadd.f32 %v906_v20, %v1690_v56  ;;  %v989_v7 = vpop.f32.mrf.mxu1  ;;  %v1037_v38 = vmul.f32 %v1353_v18, %v1702_v45 }
 0x263   :  { %v1357_v10 = vpop.eup %1356  ;;  %1378 = vtanh.f32 %v986_v30  ;;  %v990_v25 = vadd.f32 %v989_v7, %v1690_v56  ;;  %v908_v27 = vpop.f32.mrf.mxu0  ;;  %v1039_v57 = vmul.f32 %v1355_v21, %v1702_v45 }
 0x264   :  { %v1359_v14 = vpop.eup %1358  ;;  %1380 = vtanh.f32 %v907_v24  ;;  %v909_v62 = vadd.f32 %v908_v27, %v1690_v56  ;;  %v991_v15 = vpop.f32.mrf.mxu1  ;;  %v1044_v49 = vmul.f32 %v1357_v10, %v1704_v5 }
 0x265   :  { %v1361_v2 = vpop.eup %1360  ;;  %1382 = vtanh.f32 %v990_v25  ;;  %v992_v4 = vadd.f32 %v991_v15, %v1690_v56  ;;  %v912_v55 = vpop.f32.mrf.mxu0  ;;  %v1046_v1 = vmul.f32 %v1359_v14, %v1704_v5 }
 0x266   :  { %v1363_v9 = vpop.eup %1362  ;;  %1384 = vtanh.f32 %v909_v62  ;;  %v913_v37 = vadd.f32 %v912_v55, %v1694_v26  ;;  %v995_v28 = vpop.f32.mrf.mxu1  ;;  %v1045_v39 = vmul.f32 %v1361_v2, %v1704_v5  ;;  %v1060_v56 = vadd.f32 %v1044_v49, %v1036_v52 }
 0x267   :  { %v1365_v41 = vpop.eup %1364  ;;  %1386 = vtanh.f32 %v992_v4  ;;  %v996_v31 = vadd.f32 %v995_v28, %v1694_v26  ;;  %v1047_v29 = vmul.f32 %v1363_v9, %v1704_v5  ;;  %v914_v42 = vpop.f32.mrf.mxu0  ;;  %v1076_v6 = vadd.f32 %v1046_v1, %v1038_v16 }
 0x268   :  { %v1367_v32 = vpop.eup %1366  ;;  %1388 = vtanh.f32 %v913_v37  ;;  %v915_v19 = vadd.f32 %v914_v42, %v1694_v26  ;;  %v997_v46 = vpop.f32.mrf.mxu1  ;;  %v1052_v34 = vmul.f32 %v1365_v41, %v1714_v35  ;;  %v1068_v33 = vadd.f32 %v1045_v39, %v1037_v38 }
 0x269   :  { %v1369_v51 = vpop.eup %1368  ;;  %1390 = vtanh.f32 %v996_v31  ;;  %v998_v47 = vadd.f32 %v997_v46, %v1694_v26  ;;  %v1054_v48 = vmul.f32 %v1367_v32, %v1714_v35  ;;  %v1084_v43 = vadd.f32 %v1047_v29, %v1039_v57 }
 0x26a   :  { %v1371_v53 = vpop.eup %1370  ;;  %1392 = vtanh.f32 %v915_v19  ;;  %v1053_v50 = vmul.f32 %v1369_v51, %v1714_v35  ;;  %v1061_v54 = vadd.f32 %v1060_v56, %v1052_v34 }
 0x26b   :  { %1394 = vtanh.f32 %v998_v47  ;;  %v1055_v58 = vmul.f32 %v1371_v53, %v1714_v35  ;;  %v1077_v59 = vadd.f32 %v1076_v6, %v1054_v48 }
 0x26c   :  { %v1069_v3 = vadd.f32 %v1068_v33, %v1053_v50  ;;  %v1062_v44 = vrot.slane %v1061_v54, 4  ;;  %v1406_v33 = vmov 1966171168  }
 0x26d   :  { %v1373_v63 = vpop.eup %1372  ;;  %v1085_v0 = vadd.f32 %v1084_v43, %v1055_v58  ;;  %v1078_v8 = vrot.slane %v1077_v59, 4  ;;  %v1150_v50 = vunpack.c.l.s4 %v1406_v33 }
 0x26e   :  { %v1375_v12 = vpop.eup %1374  ;;  %v1070_v26 = vrot.slane %v1069_v3, 4  ;;  %v1063_v61 = vadd.f32 %v1062_v44, %v1061_v54  ;;  %v1040_v14 = vmul.f32 %v1373_v63, %v1702_v45 }
 0x26f   :  { %v1377_v13 = vpop.eup %1376  ;;  %v1079_v23 = vadd.f32 %v1078_v8, %v1077_v59  ;;  %v1086_v17 = vrot.slane %v1085_v0, 4  ;;  %v1042_v49 = vmul.f32 %v1375_v12, %v1702_v45 }
 0x270   :  { %v1379_v36 = vpop.eup %1378  ;;  %v1071_v60 = vadd.f32 %v1070_v26, %v1069_v3  ;;  %v1064_v7 = vrot.slane %v1063_v61, 2  ;;  %v1041_v16 = vmul.f32 %v1377_v13, %v1702_v45  ;;  %v1151_v13 = vunpack.c.0.s8 %v1150_v50 }
 0x271   :  { %v1381_v22 = vpop.eup %1380  ;;  %v1087_v40 = vadd.f32 %v1086_v17, %v1085_v0  ;;  %v1080_v10 = vrot.slane %v1079_v23, 2  ;;  %v1043_v1 = vmul.f32 %v1379_v36, %v1702_v45 }
 0x272   :  { %v1383_v18 = vpop.eup %1382  ;;  %v1048_v30 = vmul.f32 %v1381_v22, %v1704_v5  ;;  %v1072_v20 = vrot.slane %v1071_v60, 2  ;;  %v1065_v41 = vadd.f32 %v1064_v7, %v1063_v61  ;;  %v1127_v61 = vpop.permute.xlu1 %1126 }
 0x273   :  { %v1385_v21 = vpop.eup %1384  ;;  %v1050_v24 = vmul.f32 %v1383_v18, %v1704_v5  ;;  %v1088_v25 = vrot.slane %v1087_v40, 2  ;;  %v1081_v31 = vadd.f32 %v1080_v10, %v1079_v23  ;;  %v1154_v10 = vsub.s32 %v1151_v13, %v1457_v11 }
 0x274   :  { %v1387_v27 = vpop.eup %1386  ;;  %v1049_v62 = vmul.f32 %v1385_v21, %v1704_v5  ;;  %v1073_v15 = vadd.f32 %v1072_v20, %v1071_v60  ;;  %v1092_v9 = vadd.f32 %v1048_v30, %v1040_v14  ;;  %v1066_v47 = vrot.slane %v1065_v41, 1 }
 0x275   :  { %v1389_v52 = vpop.eup %1388  ;;  %v1051_v2 = vmul.f32 %v1387_v27, %v1704_v5  ;;  %v1089_v4 = vadd.f32 %v1088_v25, %v1087_v40  ;;  %v1108_v38 = vadd.f32 %v1050_v24, %v1042_v49  ;;  %v1082_v48 = vrot.slane %v1081_v31, 1 }
 0x276   :  { %v1391_v55 = vpop.eup %1390  ;;  %v1056_v37 = vmul.f32 %v1389_v52, %v1714_v35  ;;  %v1100_v29 = vadd.f32 %v1049_v62, %v1041_v16  ;;  %v1074_v32 = vrot.slane %v1073_v15, 1  ;;  %v1067_v8 = vadd.f32 %v1066_v47, %v1065_v41 }
 0x277   :  { %v1393_v28 = vpop.eup %1392  ;;  %v1058_v39 = vmul.f32 %v1391_v55, %v1714_v35  ;;  %v1116_v56 = vadd.f32 %v1051_v2, %v1043_v1  ;;  %v1090_v45 = vrot.slane %v1089_v4, 1 }
 0x278   :  { %v1395_v57 = vpop.eup %1394  ;;  %v1057_v42 = vmul.f32 %v1393_v28, %v1714_v35  ;;  %v1093_v5 = vadd.f32 %v1092_v9, %v1056_v37  ;;  %v1075_v58 = vadd.f32 %v1074_v32, %v1073_v15  ;;  %v1129_v24 = vadd.f32 %v1127_v61, %v1067_v8 }
 0x279   :  { %v1059_v19 = vmul.f32 %v1395_v57, %v1714_v35  ;;  %v1109_v46 = vadd.f32 %v1108_v38, %v1058_v39  ;;  %v1091_v59 = vadd.f32 %v1090_v45, %v1089_v4  ;;  %v1083_v35 = vadd.f32 %v1082_v48, %v1081_v31 }
 0x27a   :  { %v1101_v34 = vadd.f32 %v1100_v29, %v1057_v42  ;;  %v1094_v51 = vrot.slane %v1093_v5, 4  ;;  %v1130_v22 = vadd.f32 %v1127_v61, %v1075_v58 }
 0x27b   :  { %v1117_v6 = vadd.f32 %v1116_v56, %v1059_v19  ;;  %v1110_v53 = vrot.slane %v1109_v46, 4  ;;  %v1132_v40 = vadd.f32 %v1127_v61, %v1091_v59  ;;  %v1131_v7 = vadd.f32 %v1127_v61, %v1083_v35 }
 0x27c   :  { %v1095_v54 = vadd.f32 %v1094_v51, %v1093_v5  ;;  %v1102_v43 = vrot.slane %v1101_v34, 4  ;;  %v1145_v15 = vcombine.low %v1129_v24, %v1130_v22 }
 0x27d   :  { %v1111_v3 = vadd.f32 %v1110_v53, %v1109_v46  ;;  %v1118_v44 = vrot.slane %v1117_v6, 4  ;;  %v1146_v52 = vcombine.low %v1131_v7, %v1132_v40 }
 0x27e   :  { %v1096_v63 = vrot.slane %v1095_v54, 2  ;;  %v1103_v0 = vadd.f32 %v1102_v43, %v1101_v34  ;;  %v1155_v9 = vrot.slane %v1145_v15, %v1154_v10 }
 0x27f   :  { %v1112_v12 = vrot.slane %v1111_v3, 2  ;;  %v1119_v26 = vadd.f32 %v1118_v44, %v1117_v6  ;;  %v1162_v37 = vrot.slane %v1146_v52, %v1154_v10 }
 0x280   :  { %v1097_v23 = vadd.f32 %v1096_v63, %v1095_v54  ;;  %v1104_v17 = vrot.slane %v1103_v0, 2 }
 0x281   :  { %v1113_v36 = vadd.f32 %v1112_v12, %v1111_v3  ;;  %v1120_v60 = vrot.slane %v1119_v26, 2  ;;  %v1177_v31 = vcombine.low %v1155_v9, %v1162_v37 }
 0x282   :  { %v1098_v18 = vrot.slane %v1097_v23, 1  ;;  %v1105_v30 = vadd.f32 %v1104_v17, %v1103_v0 }
 0x283   :  { %v1114_v20 = vrot.slane %v1113_v36, 1  ;;  %v1121_v21 = vadd.f32 %v1120_v60, %v1119_v26  ;;  %v1185_v57 = vrot.slane %v1177_v31, %v1154_v10 }
 0x284   :  { %v1099_v25 = vadd.f32 %v1098_v18, %v1097_v23  ;;  %v1106_v27 = vrot.slane %v1105_v30, 1 }
 0x285   :  { %v1115_v14 = vadd.f32 %v1114_v20, %v1113_v36  ;;  %v1122_v62 = vrot.slane %v1121_v21, 1 }
 0x286   :  { %v1107_v49 = vadd.f32 %v1106_v27, %v1105_v30  ;;  %v1133_v4 = vadd.f32 %v1127_v61, %v1099_v25 }
 0x287   :  { %v1123_v2 = vadd.f32 %v1122_v62, %v1121_v21  ;;  %v1135_v16 = vadd.f32 %v1127_v61, %v1115_v14 }
 0x288   :  { %v1134_v55 = vadd.f32 %v1127_v61, %v1107_v49 }
 0x289   :  { %v1136_v1 = vadd.f32 %v1127_v61, %v1123_v2 }
 0x28a   :  { %v1147_v28 = vcombine.low %v1133_v4, %v1134_v55 }
 0x28b   :  { %v1148_v38 = vcombine.low %v1135_v16, %v1136_v1 }
 0x28c   :  { %v1169_v39 = vrot.slane %v1147_v28, %v1154_v10 }
 0x28d   :  { %v1176_v41 = vrot.slane %v1148_v38, %v1154_v10 }
 0x28f   :  { %v1178_v11 = vcombine.low %v1169_v39, %v1176_v41 }
 0x291   :  { %v1192_v29 = vrot.slane %v1178_v11, %v1154_v10 }
 0x293   :  { %v1193_v42 = vcombine.low %v1185_v57, %v1192_v29 }
 0x295   :  { %1195 = vst [vmem:[%s1746_s2] sm:$0xff] %v1193_v42 }

</bundles_post_ra>
